<compile_context>
chip_gen: v7x
topology: tpu7x:2x2x1
jax: 0.10.0
libtpu: 0.0.40
codegen_flags: <defaults>
</compile_context>

<pallas_src>
import functools

import jax
import jax.numpy as jnp
from jax import lax
from jax.experimental import pallas as pl
from jax.experimental.pallas import tpu as pltpu

# ----------------------------- DKM hyperparameters -----------------------------
TEMP = 0.5
THRESHOLD = 1e-4
MAX_ITER = 100
EPS = 1e-6
_NEG_LARGE = -1e30  # effectively -inf for padded (phantom) clusters


def _round_up(x, m):
    return (x + m - 1) // m * m


# ----------------------------- mean pooling (stand-in "Pooling" module) ---------
def _mean_pool_kernel(tok_ref, out_ref):
    # tok_ref: (TN, L, H) f32 ; out_ref: (TN, H) f32 -- mean over tokens
    out_ref[...] = jnp.mean(tok_ref[...], axis=1)


def mean_pool(tok_emb, block_n=256):
    N, L, H = tok_emb.shape
    tn = N if N <= block_n else _round_up(block_n, 8)
    return pl.pallas_call(
        _mean_pool_kernel,
        out_shape=jax.ShapeDtypeStruct((N, H), jnp.float32),
        grid=(pl.cdiv(N, tn),),
        in_specs=[pl.BlockSpec((tn, L, H), lambda i: (i, 0, 0))],
        out_specs=pl.BlockSpec((tn, H), lambda i: (i, 0)),
        compiler_params=pltpu.CompilerParams(dimension_semantics=("parallel",)),
    )(tok_emb)


# ----------------------------- fused DKM kernel ----------------------------------
def _dkm_fused_kernel(x_ref, c_init_ref, c_out_ref, a_out_ref,
                      xmm_ref, x2_ref, c_new_ref, diff_ref,
                      *, n, k, temp, threshold, max_iter, eps, mxu_dtype):
    n_pad, d_pad = x_ref.shape
    k_pad = c_init_ref.shape[0]
    inv_temp = 1.0 / temp

    # ---- hoisted, iteration-invariant work (done once) ----
    x_f32 = x_ref[...]
    x2_ref[...] = jnp.sum(x_f32 * x_f32, axis=1, keepdims=True)   # (Np, 1)
    xmm_ref[...] = x_f32.astype(mxu_dtype)                        # MXU-dtype copy of X

    def softmax_logits(c):
        # d = -||x_i - c_k||_2 ; logits = d / temp ; phantom clusters masked off
        c_mm = c.astype(mxu_dtype)
        xc = lax.dot_general(xmm_ref[...], c_mm, (((1,), (1,)), ((), ())),
                             preferred_element_type=jnp.float32)  # (Np, Kp), MXU, no c.T
        c2 = jnp.sum(c * c, axis=1, keepdims=True).T              # (1, Kp)
        sq = jnp.maximum(x2_ref[...] + c2 - 2.0 * xc, 0.0)
        logits = -jnp.sqrt(sq) * inv_temp
        if k_pad > k:
            col = lax.broadcasted_iota(jnp.int32, (1, k_pad), 1)
            logits = jnp.where(col < k, logits, _NEG_LARGE)
        return logits

    def soft_assign(c, exact):
        logits = softmax_logits(c)
        m = jnp.max(logits, axis=1, keepdims=True)
        e = jnp.exp(logits - m)
        s = jnp.sum(e, axis=1, keepdims=True)
        if exact:
            return e / s                                  # exact softmax for returned `a`
        return e * pl.reciprocal(s, approx=True)          # EUP reciprocal inside the loop

    def update_c(c):
        a = soft_assign(c, exact=False)
        if n_pad > n:  # drop contributions of padded X rows
            row = lax.broadcasted_iota(jnp.int32, (n_pad, 1), 0)
            a = a * (row < n).astype(jnp.float32)
        a_sum = jnp.sum(a, axis=0, keepdims=True) + eps            # (1, Kp)
        # scale columns of `a` by 1/a_sum before the contraction:
        # equivalent to (a.T @ X) / a_sum, with no a.T materialization.
        a_scaled = (a * pl.reciprocal(a_sum, approx=True)).astype(mxu_dtype)
        return lax.dot_general(a_scaled, xmm_ref[...], (((0,), (0,)), ((), ())),
                               preferred_element_type=jnp.float32)  # (Kp, Dp)

    def l1_diff(c_new, c_old):
        d = jnp.abs(c_new - c_old)
        return jnp.sum(jnp.sum(d, axis=1, keepdims=True), axis=0, keepdims=True)  # (1,1)

    # ---- first step (mirrors the code before torch's while loop) ----
    c0 = c_init_ref[...]
    c_out_ref[...] = c0                 # c_out holds the "current" C across the loop
    c1 = update_c(c0)
    c_new_ref[...] = c1
    diff_ref[...] = l1_diff(c1, c0)

    # ---- fixed-point loop, fully on-chip; body skipped once converged ----
    def body(i, carry):
        @pl.when(diff_ref[0, 0] > threshold)
        def _():
            c = c_new_ref[...]
            c_out_ref[...] = c
            c_new = update_c(c)
            c_new_ref[...] = c_new
            diff_ref[...] = l1_diff(c_new, c)
        return carry

    lax.fori_loop(0, max_iter, body, jnp.int32(0))

    # ---- finalize: `a` computed exactly once from the returned C ----
    a_out_ref[...] = soft_assign(c_out_ref[...], exact=True)


def dkm(X, C_init, *, temp=TEMP, threshold=THRESHOLD, max_iter=MAX_ITER, eps=EPS,
        mxu_dtype=jnp.bfloat16):
    """Mirrors DKM.forward: returns (C, a) where `a` is computed from the returned C.

    The whole fixed-point iteration runs inside one Pallas kernel; X is loaded into
    VMEM once and (C, a) are written to HBM once. Set mxu_dtype=jnp.float32 to match
    torch's f32 matmuls exactly (bf16 inputs + f32 accumulation is the TPU-fast path).
    """
    X = X.astype(jnp.float32)
    C_init = C_init.astype(jnp.float32)
    n, d = X.shape
    k = C_init.shape[0]

    # Pad to lane-dense shapes: K, D -> multiples of 128 (lanes), N -> multiple of 8.
    n_pad = max(_round_up(n, 8), 8)
    d_pad = max(_round_up(d, 128), 128)
    k_pad = max(_round_up(k, 128), 128)
    x_p = jnp.zeros((n_pad, d_pad), jnp.float32).at[:n, :d].set(X)
    c_p = jnp.zeros((k_pad, d_pad), jnp.float32).at[:k, :d].set(C_init)

    kernel = functools.partial(
        _dkm_fused_kernel, n=n, k=k, temp=float(temp), threshold=float(threshold),
        max_iter=int(max_iter), eps=float(eps), mxu_dtype=mxu_dtype)

    c_out, a_out = pl.pallas_call(
        kernel,
        out_shape=(jax.ShapeDtypeStruct((k_pad, d_pad), jnp.float32),
                   jax.ShapeDtypeStruct((n_pad, k_pad), jnp.float32)),
        grid=(1,),
        in_specs=[pl.BlockSpec((n_pad, d_pad), lambda i: (0, 0)),
                  pl.BlockSpec((k_pad, d_pad), lambda i: (0, 0))],
        out_specs=(pl.BlockSpec((k_pad, d_pad), lambda i: (0, 0)),
                   pl.BlockSpec((n_pad, k_pad), lambda i: (0, 0))),
        scratch_shapes=[
            pltpu.VMEM((n_pad, d_pad), mxu_dtype),    # MXU-dtype copy of X (cast hoisted)
            pltpu.VMEM((n_pad, 1), jnp.float32),      # ||x||^2, computed once
            pltpu.VMEM((k_pad, d_pad), jnp.float32),  # C_new
            pltpu.VMEM((1, 1), jnp.float32),          # L1 convergence diff
        ],
        compiler_params=pltpu.CompilerParams(
            dimension_semantics=("arbitrary",),
            vmem_limit_bytes=32 * 1024 * 1024,
        ),
    )(x_p, c_p)

    return c_out[:k, :d], a_out[:n, :k]


# ----------------------------- ClusteringModel-equivalent -----------------------
class ClusteringModelPallas:
    """qp_model (embedding stand-in) + fused DKM clustering; forward() == (C, a)."""

    def __init__(self, vocab_size, word_emb_dim, key):
        # Deterministic "word embedding" table (stand-in for pretrained transformer).
        self.emb_table = (
            jax.random.normal(key, (vocab_size, word_emb_dim), dtype=jnp.float32) * 0.1
        )

    def get_embedding(self, token_ids):
        # token embedding lookup (glue) + mean pooling (Pallas kernel)
        tok_emb = jnp.take(self.emb_table, token_ids, axis=0)  # (N, L, H)
        return mean_pool(tok_emb)                               # (N, H)

    def forward(self, token_ids, k, init_key):
        qp = self.get_embedding(token_ids)                      # (N, D) sentence embeddings
        # init_c = qp[random.sample(range(N), k)] -- deterministic sampling w/o replacement
        idx = jax.random.choice(init_key, qp.shape[0], shape=(k,), replace=False)
        init_c = qp[idx]
        C, a = dkm(qp, init_c)
        return C, a


# ----------------------------- demo / smoke test ---------------------------------
if __name__ == "__main__":
    key = jax.random.PRNGKey(0)
    k_emb, k_tok, k_init = jax.random.split(key, 3)

    N, L, H = 8, 8, 32      # 8 sentences, 8 tokens each, 32-d embeddings
    VOCAB = 50
    K = 4                   # number of clusters

    model = ClusteringModelPallas(vocab_size=VOCAB, word_emb_dim=H, key=k_emb)
    token_ids = jax.random.randint(k_tok, (N, L), 0, VOCAB)

    C, a = model.forward(token_ids, K, k_init)
    C = jax.block_until_ready(C)
    a = jax.block_until_ready(a)

    assert C.shape == (K, H) and a.shape == (N, K)
    assert bool(jnp.all(jnp.isfinite(C))) and bool(jnp.all(jnp.isfinite(a)))
    # assignments are a softmax over the K real clusters -> each row sums to 1
    assert bool(jnp.allclose(jnp.sum(a, axis=1), 1.0, atol=1e-5))
    # soft assignments are non-negative
    assert bool(jnp.all(a >= 0.0))

    print("KERNEL_OK")
</pallas_src>

<mosaic_0001>
module attributes {stable_mosaic.version = 11 : i64} {
  func.func @_mean_pool_kernel(%arg0: i32, %arg1: memref<8x8x32xf32, #tpu.memory_space<vmem>>, %arg2: memref<8x32xf32, #tpu.memory_space<vmem>>) attributes {dimension_semantics = [#tpu.dimension_semantics<parallel>], iteration_bounds = array<i64: 1>, scalar_prefetch = 0 : i64, scratch_operands = 0 : i64, tpu.core_type = #tpu.core_type<tc>, window_params = [{transform_indices = @transform_0, window_bounds = array<i64: 8, 8, 32>}, {transform_indices = @transform_1, window_bounds = array<i64: 8, 32>}]} {
    %c0 = arith.constant 0 : index
    %c0_0 = arith.constant 0 : index
    %c0_1 = arith.constant 0 : index
    %0 = vector.load %arg1[%c0, %c0_0, %c0_1] : memref<8x8x32xf32, #tpu.memory_space<vmem>>, vector<8x8x32xf32>
    %cst = arith.constant dense<0.000000e+00> : vector<8x32xf32>
    %1 = vector.multi_reduction <add>, %0, %cst [1] : vector<8x8x32xf32> to vector<8x32xf32>
    %cst_2 = arith.constant 8.000000e+00 : f32
    %2 = vector.broadcast %cst_2 : f32 to vector<8x32xf32>
    %3 = arith.divf %1, %2 : vector<8x32xf32>
    %c0_3 = arith.constant 0 : index
    %c0_4 = arith.constant 0 : index
    %4 = vector.load %arg2[%c0_3, %c0_4] : memref<8x32xf32, #tpu.memory_space<vmem>>, vector<8x32xf32>
    tpu.vector_store %arg2[%c0_3, %c0_4], %3 {strides = array<i32>} : memref<8x32xf32, #tpu.memory_space<vmem>>, vector<8x32xf32>,
    return
  }
  func.func @transform_0(%arg0: i32) -> (i32, i32, i32) {
    %c0_i32 = arith.constant 0 : i32
    %c0_i32_0 = arith.constant 0 : i32
    %c0_i32_1 = arith.constant 0 : i32
    return %arg0, %c0_i32, %c0_i32_0 : i32, i32, i32
  }
  func.func @transform_1(%arg0: i32) -> (i32, i32) {
    %c0_i32 = arith.constant 0 : i32
    %c0_i32_0 = arith.constant 0 : i32
    return %arg0, %c0_i32 : i32, i32
  }
}

</mosaic_0001>

<bundles_post_ra>
// kernel: tpu_custom_call.1
= control target key start
LH: loop header
LB: loop body
LE: loop exit
PB: predicated region body
PF: predicated region fallthrough
CT: control target
= control target key end

     0   :  { %6 = vsyncpa [#allocation3], 0  ;;  %s238_s0 = inlined_call_operand.hbm [shape: f32[8,8,32], index: 0, kind: input, shape index: {}]   ;;  %s239_s1 = inlined_call_operand.hbm [shape: f32[8,32], index: 1, kind: output, shape index: {}]  }
   0x1   :  { %7 = vsyncpa [#allocation4], 0  ;;  %s188_s6 = smov [#allocation2]   ;;  %s140_s10 = scalar_lea.hbm %s238_s0, 1024 }
   0x2   :  { %s13_s7 = sshll.u32 %s188_s6, 4  ;;  %p141_p0 = scmp.ne.s32.totalorder %s238_s0, %s140_s10  ;;  %s14_s7 = int_to_ptr.vmem [resolvable:$true] %s13_s7 }
   0x3   :  { %p144_p1 = scmp.lt.u32.totalorder %s140_s10, %s238_s0 }
   0x5   :  { %p146_p2 = pnand %p144_p1, %p141_p0 }
   0x7   :  { %149 = shalt.err (!%p146_p2)
}
   0x8   :  { %s150_s15 = scalar_lea.vmem %s14_s7, 1024  ;;  %p155_p4 = scmp.lt.s32.totalorder %s14_s7, %s14_s7 }
   0x9   :  { %p151_p3 = scmp.ne.s32.totalorder %s14_s7, %s150_s15  ;;  %p156_p5 = scmp.lt.s32.totalorder %s150_s15, %s150_s15 }
   0xb   :  { %p157_p6 = por %p156_p5, %p155_p4 }
   0xd   :  { %p158_p7 = pnand %p157_p6, %p151_p3 }
   0xf   :  { %161 = shalt.err (!%p158_p7)
}
  0x10   :  { %s189_s16 = smov 128   ;;  %s190_s17 = smov 8  }
  0x11   :  { %19 = dma.hbm_to_vmem [thread:$0]  %s238_s0, 1024, %s14_s7, [#allocation3], %s189_s16, %s189_s16, %s190_s17  }
  0x12   :  { %184 = dma.done.wait [#allocation3], 1024  }
  0x13   :  { %185 = vsyncadd [#allocation3], 4294966272  ;;  %vm31_vm0 = vcmask 261120   ;;  %v23_v0 = vld [vmem:[#allocation2] sm:$0xff]  ;;  %v24_v1 = vld [vmem:[#allocation2 + $0x8] sm:$0xff]  ;;  %vm105_vm1 = vcmask 1041409  }
  0x14   :  { %v25_v2 = vld [vmem:[#allocation2 + $0x10] sm:$0xff]  ;;  %v26_v3 = vld [vmem:[#allocation2 + $0x18] sm:$0xff]  ;;  %v27_v4 = vld [vmem:[#allocation2 + $0x20] sm:$0xff]  ;;  %v32_v6 = vsel %vm31_vm0, %v23_v0, 0.0  ;;  %v39_v7 = vsel %vm31_vm0, %v24_v1, 0.0  ;;  %vm107_vm2 = vcmask 1042434  }
  0x15   :  { %v28_v5 = vld [vmem:[#allocation2 + $0x28] sm:$0xff]  ;;  %v46_v8 = vsel %vm31_vm0, %v25_v2, 0.0  ;;  %v29_v9 = vld [vmem:[#allocation2 + $0x30] sm:$0xff]  ;;  %v30_v10 = vld [vmem:[#allocation2 + $0x38] sm:$0xff]  ;;  %v33_v11 = vrot.slane %v32_v6, 4  ;;  %v40_v12 = vrot.slane %v39_v7, 4 }
  0x16   :  { %v47_v13 = vrot.slane %v46_v8, 4  ;;  %v53_v14 = vsel %vm31_vm0, %v26_v3, 0.0  ;;  %v60_v16 = vsel %vm31_vm0, %v27_v4, 0.0  ;;  %v67_v17 = vsel %vm31_vm0, %v28_v5, 0.0  ;;  %s191_s0 = smov [#allocation5]  }
  0x17   :  { %v54_v15 = vrot.slane %v53_v14, 4  ;;  %v74_v18 = vsel %vm31_vm0, %v29_v9, 0.0  ;;  %v34_v19 = vadd.f32 %v33_v11, %v32_v6  ;;  %v41_v20 = vadd.f32 %v40_v12, %v39_v7  ;;  %s127_s20 = sshll.u32 %s191_s0, 4  ;;  %s128_s20 = int_to_ptr.vmem [resolvable:$true] %s127_s20 }
  0x18   :  { %v48_v21 = vadd.f32 %v47_v13, %v46_v8  ;;  %v61_v22 = vrot.slane %v60_v16, 4  ;;  %v68_v24 = vrot.slane %v67_v17, 4  ;;  %v75_v25 = vrot.slane %v74_v18, 4  ;;  %s162_s21 = scalar_lea.vmem %s128_s20, 128  ;;  %p167_p9 = scmp.lt.s32.totalorder %s128_s20, %s128_s20 }
  0x19   :  { %v55_v23 = vadd.f32 %v54_v15, %v53_v14  ;;  %v81_v26 = vsel %vm31_vm0, %v30_v10, 0.0  ;;  %v35_v27 = vrot.slane %v34_v19, 2  ;;  %v42_v28 = vrot.slane %v41_v20, 2  ;;  %p163_p8 = scmp.ne.s32.totalorder %s128_s20, %s162_s21  ;;  %p168_p10 = scmp.lt.s32.totalorder %s162_s21, %s162_s21 }
  0x1a   :  { %v49_v29 = vrot.slane %v48_v21, 2  ;;  %v62_v30 = vadd.f32 %v61_v22, %v60_v16  ;;  %v69_v32 = vadd.f32 %v68_v24, %v67_v17  ;;  %v76_v33 = vadd.f32 %v75_v25, %v74_v18 }
  0x1b   :  { %v56_v31 = vrot.slane %v55_v23, 2  ;;  %v82_v34 = vrot.slane %v81_v26, 4  ;;  %vm109_vm3 = vcmask 1043459   ;;  %v36_v35 = vadd.f32 %v35_v27, %v34_v19  ;;  %p169_p11 = por %p168_p10, %p167_p9 }
  0x1c   :  { %v43_v36 = vadd.f32 %v42_v28, %v41_v20  ;;  %v50_v37 = vadd.f32 %v49_v29, %v48_v21  ;;  %v63_v38 = vrot.slane %v62_v30, 2  ;;  %v70_v40 = vrot.slane %v69_v32, 2 }
  0x1d   :  { %v57_v39 = vadd.f32 %v56_v31, %v55_v23  ;;  %v77_v41 = vrot.slane %v76_v33, 2  ;;  %v83_v42 = vadd.f32 %v82_v34, %v81_v26  ;;  %v37_v43 = vrot.slane %v36_v35, 1  ;;  %p170_p12 = pnand %p169_p11, %p163_p8 }
  0x1e   :  { %v44_v44 = vrot.slane %v43_v36, 1  ;;  %v51_v45 = vrot.slane %v50_v37, 1  ;;  %v64_v46 = vadd.f32 %v63_v38, %v62_v30  ;;  %v71_v48 = vadd.f32 %v70_v40, %v69_v32 }
  0x1f   :  { %v58_v47 = vrot.slane %v57_v39, 1  ;;  %v78_v49 = vadd.f32 %v77_v41, %v76_v33  ;;  %v84_v50 = vrot.slane %v83_v42, 2  ;;  %v38_v51 = vadd.f32 %v37_v43, %v36_v35 }
  0x20   :  { %v45_v52 = vadd.f32 %v44_v44, %v43_v36  ;;  %v52_v53 = vadd.f32 %v51_v45, %v50_v37  ;;  %v65_v54 = vrot.slane %v64_v46, 1  ;;  %v72_v56 = vrot.slane %v71_v48, 1 }
  0x21   :  { %v59_v55 = vadd.f32 %v58_v47, %v57_v39  ;;  %v79_v57 = vrot.slane %v78_v49, 1  ;;  %v85_v58 = vadd.f32 %v84_v50, %v83_v42  ;;  %v89_v60 = vmul.f32 0.125, %v38_v51 }
  0x22   :  { %v66_v59 = vadd.f32 %v65_v54, %v64_v46  ;;  %v90_v61 = vmul.f32 0.125, %v45_v52  ;;  %v91_v62 = vmul.f32 0.125, %v52_v53  ;;  %v73_v63 = vadd.f32 %v72_v56, %v71_v48 }
  0x23   :  { %v80_v0 = vadd.f32 %v79_v57, %v78_v49  ;;  %v86_v1 = vrot.slane %v85_v58, 1  ;;  %v92_v2 = vmul.f32 0.125, %v59_v55  ;;  %vm111_vm4 = vcmask 1044484  }
  0x24   :  { %v93_v3 = vmul.f32 0.125, %v66_v59  ;;  %v106_v4 = vsel %vm105_vm1, %v90_v61, %v89_v60  ;;  %vm113_vm5 = vcmask 1045509   ;;  %v94_v6 = vmul.f32 0.125, %v73_v63 }
  0x25   :  { %v87_v5 = vadd.f32 %v86_v1, %v85_v58  ;;  %v95_v7 = vmul.f32 0.125, %v80_v0  ;;  %v108_v8 = vsel %vm107_vm2, %v91_v62, %v106_v4  ;;  %vm115_vm6 = vcmask 1046534  }
  0x26   :  { %v110_v9 = vsel %vm109_vm3, %v92_v2, %v108_v8  ;;  %vm117_vm7 = vcmask 1047559  }
  0x27   :  { %v96_v10 = vmul.f32 0.125, %v87_v5  ;;  %v112_v11 = vsel %vm111_vm4, %v93_v3, %v110_v9 }
  0x28   :  { %v114_v12 = vsel %vm113_vm5, %v94_v6, %v112_v11 }
  0x29   :  { %v116_v13 = vsel %vm115_vm6, %v95_v7, %v114_v12 }
  0x2a   :  { %v118_v14 = vsel %vm117_vm7, %v96_v10, %v116_v13 }
  0x2b   :  { %120 = vst.msk [vmem:[#allocation5] sm:$0xff] %vm31_vm0, %v118_v14 }
  0x2c   :  { %173 = shalt.err (!%p170_p12)
}
  0x2d   :  { %s174_s24 = scalar_lea.hbm %s239_s1, 128 }
  0x2e   :  { %p175_p13 = scmp.ne.s32.totalorder %s239_s1, %s174_s24  ;;  %p178_p0 = scmp.lt.u32.totalorder %s174_s24, %s239_s1 }
  0x30   :  { %p180_p1 = pnand %p178_p0, %p175_p13 }
  0x32   :  { %183 = shalt.err (!%p180_p1)
}
  0x33   :  { %130 = dma.vmem_to_hbm [thread:$0]  %s128_s20, 128, %s239_s1, [#allocation4]  }
  0x34   :  { %186 = dma.done.wait [#allocation4], 128  }
  0x35   :  { %187 = vsyncadd [#allocation4], 4294967168 }
  0x36   :  { %134 = vsyncpa [#allocation3], 1 }
  0x37   :  { %135 = vsyncpa [#allocation4], 1 }

</bundles_post_ra>
